<compile_context>
chip_gen: v5e
topology: v5e:2x2
jax: 0.10.0
libtpu: 0.0.40
codegen_flags: <defaults>
</compile_context>

<pallas_src>
import functools

import jax
import jax.numpy as jnp
from jax.experimental import pallas as pl
from jax.experimental.pallas import tpu as pltpu

# ---- model hyper-parameters (small, consistent with the module) ----
VOC_SIZE = 32                       # vocabulary
HIDDEN_DIM = 16                     # embedding dim
LSTM_HIDDEN = 2 * HIDDEN_DIM        # 32  (hidden_size = hidden_dim * 2)
GATE_DIM = 4 * LSTM_HIDDEN          # 128 (i, f, g, o) -> one lane-dense vreg
IN_CAT = HIDDEN_DIM + LSTM_HIDDEN   # 48  contraction dim of the fused matmul
VOC_PAD = 128                       # vocab padded to a full 128-lane vreg
NEG_BIG = -1e30                     # padded logits -> exp underflows to 0
BATCH = 2


def _decoder_kernel(ids_ref,                 # SMEM [T, B] int32 (scalar prefetch)
                    emb_ref,                 # VMEM [V, H]        (resident)
                    h0_ref, c0_ref,          # VMEM [B, 2H]       (resident)
                    wxh_ref, blstm_ref,      # VMEM [48, 128], [1, 128] (resident)
                    wfc_ref, bfc_ref,        # VMEM [2H, 128], [1, 128] (resident)
                    out_ref,                 # VMEM [1, B, 128]   (per-step block)
                    hout_ref, cout_ref,      # VMEM [B, 2H] (resident; carries state)
                    xh_ref):                 # VMEM scratch [B, 48]
    t = pl.program_id(0)

    # Load the initial state into the VMEM-resident state outputs once.
    @pl.when(t == 0)
    def _():
        hout_ref[...] = h0_ref[...]
        cout_ref[...] = c0_ref[...]

    h_prev = hout_ref[...]
    c_prev = cout_ref[...]

    # Embedding gather (token ids from SMEM) directly into the fused [x, h]
    # operand, so the two LSTM matmuls collapse into a single K=48 dot.
    for b in range(xh_ref.shape[0]):
        tok = ids_ref[t, b]
        xh_ref[pl.ds(b, 1), 0:HIDDEN_DIM] = emb_ref[pl.ds(tok, 1), :]
    xh_ref[:, HIDDEN_DIM:IN_CAT] = h_prev

    # LSTM cell: gates = [x, h] @ [W_ih; W_hh]^T + (b_ih + b_hh)   -> [B, 128]
    gates = (jnp.dot(xh_ref[...], wxh_ref[...],
                     preferred_element_type=jnp.float32) + blstm_ref[...])
    # PyTorch gate order: input, forget, cell(g), output
    i_g = jax.nn.sigmoid(gates[:, 0 * LSTM_HIDDEN:1 * LSTM_HIDDEN])
    f_g = jax.nn.sigmoid(gates[:, 1 * LSTM_HIDDEN:2 * LSTM_HIDDEN])
    g_g = jnp.tanh(gates[:, 2 * LSTM_HIDDEN:3 * LSTM_HIDDEN])
    o_g = jax.nn.sigmoid(gates[:, 3 * LSTM_HIDDEN:4 * LSTM_HIDDEN])

    c_new = f_g * c_prev + i_g * g_g
    h_new = o_g * jnp.tanh(c_new)
    hout_ref[...] = h_new
    cout_ref[...] = c_new

    # fc over the padded (lane-dense) vocab + log-softmax.  Padded columns have
    # zero weights and NEG_BIG bias so max / sum-exp stay exact.
    logits = (jnp.dot(h_new, wfc_ref[...],
                      preferred_element_type=jnp.float32) + bfc_ref[...])
    m = jnp.max(logits, axis=-1, keepdims=True)
    shifted = logits - m
    lse = jnp.log(jnp.sum(jnp.exp(shifted), axis=-1, keepdims=True))
    out_ref[...] = (shifted - lse)[None, :, :]


@jax.jit
def _decode_fused(params, token_seq, h0, c0):
    """Fused decode: token_seq int32 [T, B], h0/c0 f32 [B, 2H]."""
    T, B = token_seq.shape
    grid_spec = pltpu.PrefetchScalarGridSpec(
        num_scalar_prefetch=1,
        grid=(T,),
        in_specs=[
            pl.BlockSpec((VOC_SIZE, HIDDEN_DIM), lambda t, ids: (0, 0)),   # emb
            pl.BlockSpec((B, LSTM_HIDDEN), lambda t, ids: (0, 0)),         # h0
            pl.BlockSpec((B, LSTM_HIDDEN), lambda t, ids: (0, 0)),         # c0
            pl.BlockSpec((IN_CAT, GATE_DIM), lambda t, ids: (0, 0)),       # w_xh
            pl.BlockSpec((1, GATE_DIM), lambda t, ids: (0, 0)),            # b_lstm
            pl.BlockSpec((LSTM_HIDDEN, VOC_PAD), lambda t, ids: (0, 0)),   # w_fc
            pl.BlockSpec((1, VOC_PAD), lambda t, ids: (0, 0)),             # b_fc
        ],
        out_specs=(
            pl.BlockSpec((1, B, VOC_PAD), lambda t, ids: (t, 0, 0)),       # log_probs
            pl.BlockSpec((B, LSTM_HIDDEN), lambda t, ids: (0, 0)),         # h final
            pl.BlockSpec((B, LSTM_HIDDEN), lambda t, ids: (0, 0)),         # c final
        ),
        scratch_shapes=[pltpu.VMEM((B, IN_CAT), jnp.float32)],
    )
    out, h1, c1 = pl.pallas_call(
        _decoder_kernel,
        grid_spec=grid_spec,
        out_shape=(
            jax.ShapeDtypeStruct((T, B, VOC_PAD), jnp.float32),
            jax.ShapeDtypeStruct((B, LSTM_HIDDEN), jnp.float32),
            jax.ShapeDtypeStruct((B, LSTM_HIDDEN), jnp.float32),
        ),
        compiler_params=pltpu.CompilerParams(
            dimension_semantics=("arbitrary",)),
    )(token_seq, params["emb"], h0, c0,
      params["w_xh_t"], params["b_lstm"], params["w_fc_t"], params["b_fc"])
    return out, h1, c1


def decoder_forward(params, token_ids, hidden, cell):
    """Exactly the PyTorch module's forward (one step).

    token_ids: int32 [B]; hidden/cell: f32 [1, B, 2H] (num_layers=1 axis).
    Returns (log_probs [B, V], (hidden', cell')).
    """
    out, h1, c1 = _decode_fused(params, token_ids[None, :], hidden[0], cell[0])
    return out[0, :, :VOC_SIZE], (h1[None, :, :], c1[None, :, :])


def decoder_decode(params, token_seq, hidden, cell):
    """Teacher-forced multi-step decode, fused into ONE pallas_call.

    token_seq: int32 [T, B].  Returns (log_probs [T, B, V], (hidden', cell')).
    """
    out, h1, c1 = _decode_fused(params, token_seq, hidden[0], cell[0])
    return out[:, :, :VOC_SIZE], (h1[None, :, :], c1[None, :, :])


def init_params(key):
    """Deterministic PyTorch-style init; returns (kernel params, raw params)."""
    ks = jax.random.split(key, 7)
    bound = 1.0 / jnp.sqrt(LSTM_HIDDEN)

    emb = jax.random.normal(ks[0], (VOC_SIZE, HIDDEN_DIM), jnp.float32)
    w_ih = jax.random.uniform(ks[1], (GATE_DIM, HIDDEN_DIM), jnp.float32, -bound, bound)
    w_hh = jax.random.uniform(ks[2], (GATE_DIM, LSTM_HIDDEN), jnp.float32, -bound, bound)
    b_ih = jax.random.uniform(ks[3], (GATE_DIM,), jnp.float32, -bound, bound)
    b_hh = jax.random.uniform(ks[4], (GATE_DIM,), jnp.float32, -bound, bound)
    w_fc = jax.random.uniform(ks[5], (VOC_SIZE, LSTM_HIDDEN), jnp.float32, -bound, bound)
    b_fc = jax.random.uniform(ks[6], (VOC_SIZE,), jnp.float32, -bound, bound)

    # Fused [x, h] weight [48, 128] and combined bias [1, 128].
    w_xh_t = jnp.concatenate([w_ih.T, w_hh.T], axis=0)
    b_lstm = (b_ih + b_hh).reshape(1, GATE_DIM)
    # fc weight/bias padded to a lane-dense 128-wide vocab.
    w_fc_t = jnp.zeros((LSTM_HIDDEN, VOC_PAD), jnp.float32).at[:, :VOC_SIZE].set(w_fc.T)
    b_fc_p = jnp.full((1, VOC_PAD), NEG_BIG, jnp.float32).at[:, :VOC_SIZE].set(b_fc)

    params = {"emb": emb, "w_xh_t": w_xh_t, "b_lstm": b_lstm,
              "w_fc_t": w_fc_t, "b_fc": b_fc_p}
    raw = {"emb": emb, "w_ih": w_ih, "w_hh": w_hh, "b": b_ih + b_hh,
           "w_fc": w_fc, "b_fc": b_fc}
    return params, raw


def _reference_step(raw, token_ids, hidden, cell):
    """Pure-JAX reference matching the PyTorch module."""
    x = raw["emb"][token_ids]                              # [B, H]
    h0, c0 = hidden[0], cell[0]
    gates = x @ raw["w_ih"].T + h0 @ raw["w_hh"].T + raw["b"]
    i, f, g, o = jnp.split(gates, 4, axis=1)
    i, f, o = jax.nn.sigmoid(i), jax.nn.sigmoid(f), jax.nn.sigmoid(o)
    g = jnp.tanh(g)
    c1 = f * c0 + i * g
    h1 = o * jnp.tanh(c1)
    logits = h1 @ raw["w_fc"].T + raw["b_fc"]
    return jax.nn.log_softmax(logits, axis=1), h1, c1


if __name__ == "__main__":
    key = jax.random.PRNGKey(0)
    pkey, k_tok, k_h, k_c, k_seq = jax.random.split(key, 5)

    params, raw = init_params(pkey)
    token_ids = jax.random.randint(k_tok, (BATCH,), 0, VOC_SIZE, dtype=jnp.int32)
    hidden = jax.random.normal(k_h, (1, BATCH, LSTM_HIDDEN), jnp.float32)
    cell = jax.random.normal(k_c, (1, BATCH, LSTM_HIDDEN), jnp.float32)

    # --- single step: semantics of Decoder.forward ---
    log_probs, (h1, c1) = decoder_forward(params, token_ids, hidden, cell)
    jax.block_until_ready((log_probs, h1, c1))
    assert log_probs.shape == (BATCH, VOC_SIZE)
    assert h1.shape == (1, BATCH, LSTM_HIDDEN)
    assert c1.shape == (1, BATCH, LSTM_HIDDEN)

    ref_lp, ref_h1, ref_c1 = _reference_step(raw, token_ids, hidden, cell)
    assert jnp.allclose(log_probs, ref_lp, atol=1e-4, rtol=1e-4)
    assert jnp.allclose(h1[0], ref_h1, atol=1e-5, rtol=1e-5)
    assert jnp.allclose(c1[0], ref_c1, atol=1e-5, rtol=1e-5)

    # --- fused multi-step (teacher-forced) decode in ONE pallas_call ---
    T = 8
    token_seq = jax.random.randint(k_seq, (T, BATCH), 0, VOC_SIZE, dtype=jnp.int32)
    seq_lp, (hT, cT) = decoder_decode(params, token_seq, hidden, cell)
    jax.block_until_ready((seq_lp, hT, cT))
    assert seq_lp.shape == (T, BATCH, VOC_SIZE)
    # step 0 of the fused decode must match the single-step call
    lp0, _ = decoder_forward(params, token_seq[0], hidden, cell)
    assert jnp.allclose(seq_lp[0], lp0, atol=1e-4, rtol=1e-4)

    # TODO(synk): true autoregressive decode (sampling the next token inside the
    # kernel) is out of scope of the module's forward(), which takes tokens as input.

    print("KERNEL_OK")
</pallas_src>

<mosaic_0001>
module attributes {stable_mosaic.version = 11 : i64} {
  func.func @_decoder_kernel(%arg0: i32, %arg1: memref<1x2xi32, #tpu.memory_space<smem>>, %arg2: memref<32x16xf32, #tpu.memory_space<vmem>>, %arg3: memref<2x32xf32, #tpu.memory_space<vmem>>, %arg4: memref<2x32xf32, #tpu.memory_space<vmem>>, %arg5: memref<48x128xf32, #tpu.memory_space<vmem>>, %arg6: memref<1x128xf32, #tpu.memory_space<vmem>>, %arg7: memref<32x128xf32, #tpu.memory_space<vmem>>, %arg8: memref<1x128xf32, #tpu.memory_space<vmem>>, %arg9: memref<1x2x128xf32, #tpu.memory_space<vmem>>, %arg10: memref<2x32xf32, #tpu.memory_space<vmem>>, %arg11: memref<2x32xf32, #tpu.memory_space<vmem>>, %arg12: memref<2x48xf32, #tpu.memory_space<vmem>>) attributes {dimension_semantics = [#tpu.dimension_semantics<arbitrary>], iteration_bounds = array<i64: 1>, scalar_prefetch = 1 : i64, scratch_operands = 1 : i64, tpu.core_type = #tpu.core_type<tc>, window_params = [{pipeline_mode = #tpu.pipeline_mode<synchronous>, transform_indices = @transform_0, window_bounds = array<i64: 32, 16>}, {pipeline_mode = #tpu.pipeline_mode<synchronous>, transform_indices = @transform_1, window_bounds = array<i64: 2, 32>}, {pipeline_mode = #tpu.pipeline_mode<synchronous>, transform_indices = @transform_2, window_bounds = array<i64: 2, 32>}, {pipeline_mode = #tpu.pipeline_mode<synchronous>, transform_indices = @transform_3, window_bounds = array<i64: 48, 128>}, {pipeline_mode = #tpu.pipeline_mode<synchronous>, transform_indices = @transform_4, window_bounds = array<i64: 1, 128>}, {pipeline_mode = #tpu.pipeline_mode<synchronous>, transform_indices = @transform_5, window_bounds = array<i64: 32, 128>}, {pipeline_mode = #tpu.pipeline_mode<synchronous>, transform_indices = @transform_6, window_bounds = array<i64: 1, 128>}, {transform_indices = @transform_7, window_bounds = array<i64: 1, 2, 128>}, {pipeline_mode = #tpu.pipeline_mode<synchronous>, transform_indices = @transform_8, window_bounds = array<i64: 2, 32>}, {pipeline_mode = #tpu.pipeline_mode<synchronous>, transform_indices = @transform_9, window_bounds = array<i64: 2, 32>}]} {
    %c0_i32 = arith.constant 0 : i32
    %0 = arith.cmpi eq, %arg0, %c0_i32 : i32
    %1 = arith.extui %0 : i1 to i32
    %c0_i32_0 = arith.constant 0 : i32
    %2 = arith.cmpi ne, %1, %c0_i32_0 : i32
    scf.if %2 {
      %c0_35 = arith.constant 0 : index
      %c0_36 = arith.constant 0 : index
      %66 = vector.load %arg3[%c0_35, %c0_36] : memref<2x32xf32, #tpu.memory_space<vmem>>, vector<2x32xf32>
      %c0_37 = arith.constant 0 : index
      %c0_38 = arith.constant 0 : index
      %67 = vector.load %arg10[%c0_37, %c0_38] : memref<2x32xf32, #tpu.memory_space<vmem>>, vector<2x32xf32>
      tpu.vector_store %arg10[%c0_37, %c0_38], %66 {strides = array<i32>} : memref<2x32xf32, #tpu.memory_space<vmem>>, vector<2x32xf32>,
      %c0_39 = arith.constant 0 : index
      %c0_40 = arith.constant 0 : index
      %68 = vector.load %arg4[%c0_39, %c0_40] : memref<2x32xf32, #tpu.memory_space<vmem>>, vector<2x32xf32>
      %c0_41 = arith.constant 0 : index
      %c0_42 = arith.constant 0 : index
      %69 = vector.load %arg11[%c0_41, %c0_42] : memref<2x32xf32, #tpu.memory_space<vmem>>, vector<2x32xf32>
      tpu.vector_store %arg11[%c0_41, %c0_42], %68 {strides = array<i32>} : memref<2x32xf32, #tpu.memory_space<vmem>>, vector<2x32xf32>,
    } else {
    }
    %c0 = arith.constant 0 : index
    %c0_1 = arith.constant 0 : index
    %3 = vector.load %arg10[%c0, %c0_1] : memref<2x32xf32, #tpu.memory_space<vmem>>, vector<2x32xf32>
    %c0_2 = arith.constant 0 : index
    %c0_3 = arith.constant 0 : index
    %4 = vector.load %arg11[%c0_2, %c0_3] : memref<2x32xf32, #tpu.memory_space<vmem>>, vector<2x32xf32>
    %5 = arith.index_cast %arg0 : i32 to index
    %c0_4 = arith.constant 0 : index
    %6 = memref.load %arg1[%5, %c0_4] : memref<1x2xi32, #tpu.memory_space<smem>>
    %7 = arith.index_cast %6 : i32 to index
    %c0_5 = arith.constant 0 : index
    %8 = vector.load %arg2[%7, %c0_5] : memref<32x16xf32, #tpu.memory_space<vmem>>, vector<1x16xf32>
    %c0_6 = arith.constant 0 : index
    %c0_7 = arith.constant 0 : index
    %9 = vector.load %arg12[%c0_6, %c0_7] : memref<2x48xf32, #tpu.memory_space<vmem>>, vector<1x16xf32>
    tpu.vector_store %arg12[%c0_6, %c0_7], %8 {strides = array<i32>} : memref<2x48xf32, #tpu.memory_space<vmem>>, vector<1x16xf32>,
    %10 = arith.index_cast %arg0 : i32 to index
    %c1 = arith.constant 1 : index
    %11 = memref.load %arg1[%10, %c1] : memref<1x2xi32, #tpu.memory_space<smem>>
    %12 = arith.index_cast %11 : i32 to index
    %c0_8 = arith.constant 0 : index
    %13 = vector.load %arg2[%12, %c0_8] : memref<32x16xf32, #tpu.memory_space<vmem>>, vector<1x16xf32>
    %c1_9 = arith.constant 1 : index
    %c0_10 = arith.constant 0 : index
    %14 = vector.load %arg12[%c1_9, %c0_10] : memref<2x48xf32, #tpu.memory_space<vmem>>, vector<1x16xf32>
    tpu.vector_store %arg12[%c1_9, %c0_10], %13 {strides = array<i32>} : memref<2x48xf32, #tpu.memory_space<vmem>>, vector<1x16xf32>,
    %c0_11 = arith.constant 0 : index
    %c16 = arith.constant 16 : index
    %15 = vector.load %arg12[%c0_11, %c16] : memref<2x48xf32, #tpu.memory_space<vmem>>, vector<2x32xf32>
    tpu.vector_store %arg12[%c0_11, %c16], %3 {strides = array<i32>} : memref<2x48xf32, #tpu.memory_space<vmem>>, vector<2x32xf32>,
    %c0_12 = arith.constant 0 : index
    %c0_13 = arith.constant 0 : index
    %16 = vector.load %arg12[%c0_12, %c0_13] : memref<2x48xf32, #tpu.memory_space<vmem>>, vector<2x48xf32>
    %c0_14 = arith.constant 0 : index
    %c0_15 = arith.constant 0 : index
    %17 = vector.load %arg5[%c0_14, %c0_15] : memref<48x128xf32, #tpu.memory_space<vmem>>, vector<48x128xf32>
    %cst = arith.constant dense<0.000000e+00> : vector<2x128xf32>
    %18 = tpu.matmul %16, %17, %cst {dimension_numbers = #tpu.dot_dimension_numbers<[1], [0], [0], [1], [0, 0, 1, 1], [], []>} : vector<2x48xf32>, vector<48x128xf32>, vector<2x128xf32> -> vector<2x128xf32>
    %c0_16 = arith.constant 0 : index
    %c0_17 = arith.constant 0 : index
    %19 = vector.load %arg6[%c0_16, %c0_17] : memref<1x128xf32, #tpu.memory_space<vmem>>, vector<1x128xf32>
    %20 = vector.broadcast %19 : vector<1x128xf32> to vector<2x128xf32>
    %21 = arith.addf %18, %20 : vector<2x128xf32>
    %22 = vector.extract_strided_slice %21 {offsets = [0, 0], sizes = [2, 32], strides = [1, 1]} : vector<2x128xf32> to vector<2x32xf32>
    %23 = arith.negf %22 : vector<2x32xf32>
    %24 = math.exp %23 : vector<2x32xf32>
    %cst_18 = arith.constant 1.000000e+00 : f32
    %25 = vector.broadcast %cst_18 : f32 to vector<2x32xf32>
    %26 = arith.addf %25, %24 : vector<2x32xf32>
    %27 = arith.divf %25, %26 : vector<2x32xf32>
    %28 = vector.extract_strided_slice %21 {offsets = [0, 32], sizes = [2, 32], strides = [1, 1]} : vector<2x128xf32> to vector<2x32xf32>
    %29 = arith.negf %28 : vector<2x32xf32>
    %30 = math.exp %29 : vector<2x32xf32>
    %cst_19 = arith.constant 1.000000e+00 : f32
    %31 = vector.broadcast %cst_19 : f32 to vector<2x32xf32>
    %32 = arith.addf %31, %30 : vector<2x32xf32>
    %33 = arith.divf %31, %32 : vector<2x32xf32>
    %34 = vector.extract_strided_slice %21 {offsets = [0, 64], sizes = [2, 32], strides = [1, 1]} : vector<2x128xf32> to vector<2x32xf32>
    %35 = math.tanh %34 : vector<2x32xf32>
    %36 = vector.extract_strided_slice %21 {offsets = [0, 96], sizes = [2, 32], strides = [1, 1]} : vector<2x128xf32> to vector<2x32xf32>
    %37 = arith.negf %36 : vector<2x32xf32>
    %38 = math.exp %37 : vector<2x32xf32>
    %cst_20 = arith.constant 1.000000e+00 : f32
    %39 = vector.broadcast %cst_20 : f32 to vector<2x32xf32>
    %40 = arith.addf %39, %38 : vector<2x32xf32>
    %41 = arith.divf %39, %40 : vector<2x32xf32>
    %42 = arith.mulf %33, %4 : vector<2x32xf32>
    %43 = arith.mulf %27, %35 : vector<2x32xf32>
    %44 = arith.addf %42, %43 : vector<2x32xf32>
    %45 = math.tanh %44 : vector<2x32xf32>
    %46 = arith.mulf %41, %45 : vector<2x32xf32>
    %c0_21 = arith.constant 0 : index
    %c0_22 = arith.constant 0 : index
    %47 = vector.load %arg10[%c0_21, %c0_22] : memref<2x32xf32, #tpu.memory_space<vmem>>, vector<2x32xf32>
    tpu.vector_store %arg10[%c0_21, %c0_22], %46 {strides = array<i32>} : memref<2x32xf32, #tpu.memory_space<vmem>>, vector<2x32xf32>,
    %c0_23 = arith.constant 0 : index
    %c0_24 = arith.constant 0 : index
    %48 = vector.load %arg11[%c0_23, %c0_24] : memref<2x32xf32, #tpu.memory_space<vmem>>, vector<2x32xf32>
    tpu.vector_store %arg11[%c0_23, %c0_24], %44 {strides = array<i32>} : memref<2x32xf32, #tpu.memory_space<vmem>>, vector<2x32xf32>,
    %c0_25 = arith.constant 0 : index
    %c0_26 = arith.constant 0 : index
    %49 = vector.load %arg7[%c0_25, %c0_26] : memref<32x128xf32, #tpu.memory_space<vmem>>, vector<32x128xf32>
    %cst_27 = arith.constant dense<0.000000e+00> : vector<2x128xf32>
    %50 = tpu.matmul %46, %49, %cst_27 {dimension_numbers = #tpu.dot_dimension_numbers<[1], [0], [0], [1], [0, 0, 1, 1], [], []>} : vector<2x32xf32>, vector<32x128xf32>, vector<2x128xf32> -> vector<2x128xf32>
    %c0_28 = arith.constant 0 : index
    %c0_29 = arith.constant 0 : index
    %51 = vector.load %arg8[%c0_28, %c0_29] : memref<1x128xf32, #tpu.memory_space<vmem>>, vector<1x128xf32>
    %52 = vector.broadcast %51 : vector<1x128xf32> to vector<2x128xf32>
    %53 = arith.addf %50, %52 : vector<2x128xf32>
    %cst_30 = arith.constant dense<0xFF800000> : vector<2xf32>
    %54 = vector.multi_reduction <maximumf>, %53, %cst_30 [1] : vector<2x128xf32> to vector<2xf32>
    %55 = vector.shape_cast %54 : vector<2xf32> to vector<2x1xf32>
    %56 = vector.broadcast %55 : vector<2x1xf32> to vector<2x128xf32>
    %57 = arith.subf %53, %56 : vector<2x128xf32>
    %58 = math.exp %57 : vector<2x128xf32>
    %cst_31 = arith.constant dense<0.000000e+00> : vector<2xf32>
    %59 = vector.multi_reduction <add>, %58, %cst_31 [1] : vector<2x128xf32> to vector<2xf32>
    %60 = vector.shape_cast %59 : vector<2xf32> to vector<2x1xf32>
    %61 = math.log %60 : vector<2x1xf32>
    %62 = vector.broadcast %61 : vector<2x1xf32> to vector<2x128xf32>
    %63 = arith.subf %57, %62 : vector<2x128xf32>
    %64 = vector.shape_cast %63 : vector<2x128xf32> to vector<1x2x128xf32>
    %c0_32 = arith.constant 0 : index
    %c0_33 = arith.constant 0 : index
    %c0_34 = arith.constant 0 : index
    %65 = vector.load %arg9[%c0_32, %c0_33, %c0_34] : memref<1x2x128xf32, #tpu.memory_space<vmem>>, vector<1x2x128xf32>
    tpu.vector_store %arg9[%c0_32, %c0_33, %c0_34], %64 {strides = array<i32>} : memref<1x2x128xf32, #tpu.memory_space<vmem>>, vector<1x2x128xf32>,
    return
  }
  func.func @transform_0(%arg0: i32, %arg1: memref<1x2xi32, #tpu.memory_space<smem>>) -> (i32, i32) {
    %c0_i32 = arith.constant 0 : i32
    %c0_i32_0 = arith.constant 0 : i32
    %c0_i32_1 = arith.constant 0 : i32
    return %c0_i32, %c0_i32_0 : i32, i32
  }
  func.func @transform_1(%arg0: i32, %arg1: memref<1x2xi32, #tpu.memory_space<smem>>) -> (i32, i32) {
    %c0_i32 = arith.constant 0 : i32
    %c0_i32_0 = arith.constant 0 : i32
    %c0_i32_1 = arith.constant 0 : i32
    return %c0_i32, %c0_i32_0 : i32, i32
  }
  func.func @transform_2(%arg0: i32, %arg1: memref<1x2xi32, #tpu.memory_space<smem>>) -> (i32, i32) {
    %c0_i32 = arith.constant 0 : i32
    %c0_i32_0 = arith.constant 0 : i32
    %c0_i32_1 = arith.constant 0 : i32
    return %c0_i32, %c0_i32_0 : i32, i32
  }
  func.func @transform_3(%arg0: i32, %arg1: memref<1x2xi32, #tpu.memory_space<smem>>) -> (i32, i32) {
    %c0_i32 = arith.constant 0 : i32
    %c0_i32_0 = arith.constant 0 : i32
    %c0_i32_1 = arith.constant 0 : i32
    return %c0_i32, %c0_i32_0 : i32, i32
  }
  func.func @transform_4(%arg0: i32, %arg1: memref<1x2xi32, #tpu.memory_space<smem>>) -> (i32, i32) {
    %c0_i32 = arith.constant 0 : i32
    %c0_i32_0 = arith.constant 0 : i32
    %c0_i32_1 = arith.constant 0 : i32
    return %c0_i32, %c0_i32_0 : i32, i32
  }
  func.func @transform_5(%arg0: i32, %arg1: memref<1x2xi32, #tpu.memory_space<smem>>) -> (i32, i32) {
    %c0_i32 = arith.constant 0 : i32
    %c0_i32_0 = arith.constant 0 : i32
    %c0_i32_1 = arith.constant 0 : i32
    return %c0_i32, %c0_i32_0 : i32, i32
  }
  func.func @transform_6(%arg0: i32, %arg1: memref<1x2xi32, #tpu.memory_space<smem>>) -> (i32, i32) {
    %c0_i32 = arith.constant 0 : i32
    %c0_i32_0 = arith.constant 0 : i32
    %c0_i32_1 = arith.constant 0 : i32
    return %c0_i32, %c0_i32_0 : i32, i32
  }
  func.func @transform_7(%arg0: i32, %arg1: memref<1x2xi32, #tpu.memory_space<smem>>) -> (i32, i32, i32) {
    %c0_i32 = arith.constant 0 : i32
    %c0_i32_0 = arith.constant 0 : i32
    %c0_i32_1 = arith.constant 0 : i32
    return %arg0, %c0_i32, %c0_i32_0 : i32, i32, i32
  }
  func.func @transform_8(%arg0: i32, %arg1: memref<1x2xi32, #tpu.memory_space<smem>>) -> (i32, i32) {
    %c0_i32 = arith.constant 0 : i32
    %c0_i32_0 = arith.constant 0 : i32
    %c0_i32_1 = arith.constant 0 : i32
    return %c0_i32, %c0_i32_0 : i32, i32
  }
  func.func @transform_9(%arg0: i32, %arg1: memref<1x2xi32, #tpu.memory_space<smem>>) -> (i32, i32) {
    %c0_i32 = arith.constant 0 : i32
    %c0_i32_0 = arith.constant 0 : i32
    %c0_i32_1 = arith.constant 0 : i32
    return %c0_i32, %c0_i32_0 : i32, i32
  }
}

</mosaic_0001>

<bundles_post_ra>
// kernel: _decode_fused.1
= control target key start
LH: loop header
LB: loop body
LE: loop exit
PB: predicated region body
PF: predicated region fallthrough
CT: control target
= control target key end

     0   :  { %s491_s16 = smov [#allocation4]   ;;  %s617_s0 = inlined_call_operand.hbm [shape: s32[1,2], index: 0, kind: input, shape index: {}]   ;;  %s618_s1 = inlined_call_operand.vmem [shape: f32[32,16], index: 1, kind: input, shape index: {}]   ;;  %s619_s2 = inlined_call_operand.vmem [shape: f32[2,32], index: 2, kind: input, shape index: {}]   ;;  %s620_s3 = inlined_call_operand.vmem [shape: f32[2,32], index: 3, kind: input, shape index: {}]   ;;  %s621_s4 = inlined_call_operand.vmem [shape: f32[48,128], index: 4, kind: input, shape index: {}]   ;;  %s622_s5 = inlined_call_operand.hbm [shape: f32[1,128], index: 5, kind: input, shape index: {}]   ;;  %s623_s6 = inlined_call_operand.hbm [shape: f32[32,128], index: 6, kind: input, shape index: {}]   ;;  %s624_s7 = inlined_call_operand.hbm [shape: f32[1,128], index: 7, kind: input, shape index: {}]   ;;  %s625_s8 = inlined_call_operand.hbm [shape: f32[1,2,128], index: 8, kind: output, shape index: {0}]   ;;  %s626_s9 = inlined_call_operand.hbm [shape: f32[2,32], index: 9, kind: output, shape index: {1}]   ;;  %s627_s10 = inlined_call_operand.hbm [shape: f32[2,32], index: 10, kind: output, shape index: {2}]  }
   0x1   :  { %s17_s15 = sshll.u32 %s617_s0, 4  ;;  %s18_s15 = int_to_ptr.hbm [resolvable:$true] %s17_s15 }
   0x2   :  { %20 = dma.hbm_to_smem %s18_s15, 16, %s491_s16, [#allocation3] }
   0x3   :  { %481 = dma.done.wait [#allocation3], 16 }
   0x4   :  { %482 = vsyncadd [#allocation3], 4294967280 }
   0x5   :  { %23 = sfence }
   0x6   :  { %24 = vsyncpa [#allocation6], 0 }
   0x7   :  { %25 = vsyncpa [#allocation9], 0 }
   0x8   :  { %26 = vsyncpa [#allocation7], 0  ;;  %s51_s19 = sshll.u32 %s623_s6, 4  ;;  %s52_s19 = int_to_ptr.hbm [resolvable:$true] %s51_s19 }
   0x9   :  { %27 = vsyncpa [#allocation13], 0  ;;  %s492_s20 = smov [#allocation8]   ;;  %s41_s23 = sshll.u32 %s622_s5, 4  ;;  %s42_s23 = int_to_ptr.hbm [resolvable:$true] %s41_s23 }
   0xa   :  { %s53_s21 = sshll.u32 %s492_s20, 4  ;;  %s493_s24 = smov 128   ;;  %s54_s21 = int_to_ptr.vmem [resolvable:$true] %s53_s21 }
   0xb   :  { %s494_s25 = smov 8   ;;  %s495_s26 = smov [#allocation5]  }
   0xc   :  { %59 = dma.hbm_to_vmem [thread:$0]  %s52_s19, 512, %s54_s21, [#allocation9], %s493_s24, %s493_s24, %s494_s25  }
   0xd   :  { %s43_s27 = sshll.u32 %s495_s26, 4  ;;  %s65_s30 = sshll.u32 %s624_s7, 4  ;;  %s44_s27 = int_to_ptr.vmem [resolvable:$true] %s43_s27  ;;  %s66_s30 = int_to_ptr.hbm [resolvable:$true] %s65_s30 }
   0xe   :  { %46 = dma.hbm_to_vmem [thread:$0]  %s42_s23, 16, %s44_s27, [#allocation6]  }
   0xf   :  { %s496_s6 = smov [#allocation10]  }
  0x10   :  { %s67_s11 = sshll.u32 %s496_s6, 4  ;;  %s68_s11 = int_to_ptr.vmem [resolvable:$true] %s67_s11 }
  0x11   :  { %70 = dma.hbm_to_vmem [thread:$0]  %s66_s30, 16, %s68_s11, [#allocation9]  }
  0x12   :  { %483 = dma.done.wait [#allocation6], 16  }
  0x13   :  { %484 = vsyncadd [#allocation6], 4294967280 }
  0x14   :  { %485 = dma.done.wait [#allocation9], 528  }
  0x15   :  { %486 = vsyncadd [#allocation9], 4294966768  ;;  %s95_s5 = sld [smem:[#allocation4]]  ;;  %vm88_vm0 = vcmask 254976   ;;  %vm98_vm1 = vcmask 122880   ;;  %v117_v1 = vld [vmem:[%s621_s4 + $0x28] sm:$0xff] }
  0x16   :  { %s294_s12 = sld [smem:[#allocation4 + $0x1]]  ;;  %v87_v0 = vld [vmem:[%s619_s2] sm:$0x3]  ;;  %136 = vmatpush.msra.mxu0 %v117_v1  ;;  %s497_s0 = smov 16   ;;  %v115_v6 = vld [vmem:[%s621_s4 + $0x18] sm:$0xff]  ;;  %v114_v7 = vld [vmem:[%s621_s4 + $0x10] sm:$0xff] }
  0x17   :  { %v116_v2 = vld [vmem:[%s621_s4 + $0x20] sm:$0xff]  ;;  %89 = vst.msk [vmem:[#allocation12] sm:$0x3] %vm88_vm0, %v87_v0  ;;  %v113_v8 = vld [vmem:[%s621_s4 + $0x8] sm:$0xff]  ;;  %s498_s11 = smov 32   ;;  %vm109_vm2 = vcmask 386176  }
  0x18   :  { %137 = vmatpush.msra.mxu0 %v116_v2  ;;  %v112_v9 = vld [vmem:[%s621_s4] sm:$0xff]  ;;  %vm122_vm3 = vcmask 392192   ;;  %s499_s4 = smov 64   ;;  %v200_v39 = vld [vmem:[#allocation8 + $0x10] sm:$0xff]  ;;  %v199_v40 = vld [vmem:[#allocation8 + $0x8] sm:$0xff]  ;;  %vm206_vm8 = vcmask 261120  }
  0x19   :  { %v90_v10 = vld [vmem:[%s620_s3] sm:$0x3]  ;;  %v311_v14 = vld [vmem:[#allocation5] ss:$0 sm:$0xff]  ;;  %v198_v41 = vld [vmem:[#allocation8] sm:$0xff]  ;;  %s500_s3 = smov 96  }
  0x1a   :  { %138 = vmatpush.msra.mxu0 %v115_v6  ;;  %91 = vst.msk [vmem:[#allocation14] sm:$0x3] %vm88_vm0, %v90_v10  ;;  %v201_v38 = vld [vmem:[#allocation8 + $0x18] sm:$0xff]  ;;  %v312_v46 = vld [vmem:[#allocation10] ss:$0 sm:$0xff]  ;;  %vm229_vm9 = vcmask 1041408  }
  0x1b   :  { %s96_s20 = scalar_lea.vmem %s618_s1, %s95_s5  ;;  %221 = vmatpush.msra.mxu1 %v201_v38  ;;  %s501_s5 = smov [#allocation12]  }
  0x1c   :  { %v97_v3 = vld [vmem:[%s96_s20] sm:$0x1]  ;;  %s102_s2 = scalar_lea.vmem %s618_s1, %s294_s12  ;;  %139 = vmatpush.msra.mxu0 %v114_v7  ;;  %s259_s12 = sshll.u32 %s501_s5, 4  ;;  %s260_s12 = int_to_ptr.vmem [resolvable:$true] %s259_s12 }
  0x1d   :  { %99 = vst.msk [vmem:[#allocation2] sm:$0x1] %vm98_vm1, %v97_v3  ;;  %v103_v4 = vld [vmem:[%s102_s2] sm:$0x1]  ;;  %222 = vmatpush.msra.mxu1 %v200_v39  ;;  %s261_s7 = sshll.u32 %s626_s9, 4  ;;  %s502_s15 = smov [#allocation14]   ;;  %s262_s7 = int_to_ptr.hbm [resolvable:$true] %s261_s7 }
  0x1e   :  { %104 = vst.msk [vmem:[#allocation2 + $0x1] sm:$0x1] %vm98_vm1, %v103_v4  ;;  %v92_v5 = vld [vmem:[#allocation12] sm:$0x3]  ;;  %140 = vmatpush.msra.mxu0 %v113_v8  ;;  %s270_s16 = sshll.u32 %s502_s15, 4  ;;  %s272_s19 = sshll.u32 %s627_s10, 4  ;;  %s271_s16 = int_to_ptr.vmem [resolvable:$true] %s270_s16  ;;  %s273_s19 = int_to_ptr.hbm [resolvable:$true] %s272_s19 }
  0x1f   :  { %106 = vrot.lane.b32.xlu0 %v92_v5, %s497_s0  ;;  %223 = vmatpush.msra.mxu1 %v199_v40  ;;  %s503_s20 = smov [#allocation11]   ;;  %s250_s2 = sshll.u32 %s625_s8, 4  ;;  %s251_s2 = int_to_ptr.hbm [resolvable:$true] %s250_s2 }
  0x20   :  { %141 = vmatpush.msra.mxu0 %v112_v9  ;;  %s248_s9 = sshll.u32 %s503_s20, 4  ;;  %s249_s9 = int_to_ptr.vmem [resolvable:$true] %s248_s9 }
  0x21   :  { %v93_v11 = vld [vmem:[#allocation14] sm:$0x3]  ;;  %224 = vmatpush.msra.mxu1 %v198_v41 }
  0x22   :  { %167 = vrot.lane.b32.xlu1 %v93_v11, %s498_s11 }
  0x91   :  { %v107_v12 = vpop.permute.xlu0 %106 }
  0x92   :  { %110 = vst.msk [vmem:[#allocation2] sm:$0x3] %vm109_vm2, %v107_v12 }
  0x94   :  { %v168_v33 = vpop.permute.xlu1 %167 }
  0x99   :  { %v111_v13 = vld [vmem:[#allocation2] sm:$0x3] }
  0x9a   :  { %295 = vmatmul.msk.f32.vlgmr.msra.gmra.mxu0 %vm122_vm3, %v111_v13 }
 0x117   :  { %v143_v15 = vpop.f32.mrf.mxu0 }
 0x118   :  { %v144_v16 = vadd.f32 %v311_v14, %v143_v15 }
 0x11a   :  { %313 = vtanh.f32 %v144_v16  ;;  %v296_v18 = vmul.f32 -1.442695, %v144_v16 }
 0x11c   :  { %315 = vpow2.f32 %v296_v18 }
 0x120   :  { %v314_v17 = vpop.eup %313 }
 0x121   :  { %172 = vrot.lane.b32.xlu0 %v314_v17, %s499_s4 }
 0x122   :  { %v316_v19 = vpop.eup %315 }
 0x123   :  { %v149_v20 = vadd.f32 1.0, %v316_v19 }
 0x125   :  { %317 = vrcp.f32 %v149_v20  ;;  %v161_v26 = vand.u32 2147483648, %v149_v20  ;;  %vm155_vm5 = vweird.f32 %v149_v20  ;;  %v159_v27 = vand.u32 2147483647, %v149_v20 }
 0x127   :  { %v162_v29 = vor.u32 1.1754944e-38, %v161_v26  ;;  %vm160_vm7 = vcmp.eq.f32.partialorder %v159_v27, 8.507059e+37 }
 0x12b   :  { %v318_v21 = vpop.eup %317 }
 0x12c   :  { %v151_v22 = vmul.f32 %v318_v21, %v149_v20  ;;  %vm156_vm4 = vweird.f32 %v318_v21 }
 0x12d   :  { %vm157_vm6 = vmor %vm155_vm5, %vm156_vm4 }
 0x12e   :  { %v152_v23 = vsub.f32 1.0, %v151_v22 }
 0x130   :  { %v153_v24 = vmul.f32 %v318_v21, %v152_v23 }
 0x132   :  { %v154_v25 = vadd.f32 %v318_v21, %v153_v24 }
 0x134   :  { %v158_v28 = vsel %vm157_vm6, %v318_v21, %v154_v25 }
 0x135   :  { %v163_v30 = vsel %vm160_vm7, %v162_v29, %v158_v28 }
 0x136   :  { %v170_v34 = vmul.f32 %v168_v33, %v163_v30 }
 0x193   :  { %v173_v31 = vpop.permute.xlu0 %172 }
 0x194   :  { %v175_v32 = vmul.f32 %v173_v31, %v163_v30 }
 0x196   :  { %177 = vrot.lane.b32.xlu1 %v175_v32, %s498_s11 }
 0x208   :  { %v178_v35 = vpop.permute.xlu1 %177 }
 0x209   :  { %v180_v36 = vadd.f32 %v178_v35, %v170_v34 }
 0x20b   :  { %319 = vtanh.f32 %v180_v36 }
 0x211   :  { %v320_v37 = vpop.eup %319 }
 0x212   :  { %183 = vrot.lane.b32.xlu2 %v320_v37, %s499_s4 }
 0x26c   :  { %v184_v42 = vpop.permute.xlu2 %183 }
 0x26d   :  { %v186_v43 = vmul.f32 %v184_v42, %v163_v30 }
 0x26f   :  { %188 = vrot.lane.b32.xlu2 %v186_v43, %s498_s11 }
 0x277   :  { %194 = vrot.lane.b32.xlu2 %v180_v36, %s500_s3 }
 0x2c9   :  { %v189_v44 = vpop.permute.xlu2 %188 }
 0x2ca   :  { %192 = vst.msk [vmem:[#allocation12] sm:$0x3] %vm88_vm0, %v189_v44  ;;  %297 = vmatmul.msk.f32.vlgmr.msra.gmra.mxu1 %vm206_vm8, %v189_v44 }
 0x2cb   :  { %264 = dma.vmem_to_hbm [thread:$0]  %s260_s12, 32, %s262_s7, [#allocation13]  }
 0x2d1   :  { %v195_v45 = vpop.permute.xlu2 %194 }
 0x2d2   :  { %197 = vst.msk [vmem:[#allocation14] sm:$0x3] %vm88_vm0, %v195_v45 }
 0x2d3   :  { %275 = dma.vmem_to_hbm [thread:$0]  %s271_s16, 32, %s273_s19, [#allocation13]  }
 0x347   :  { %v226_v47 = vpop.f32.mrf.mxu1 }
 0x348   :  { %v227_v48 = vadd.f32 %v312_v46, %v226_v47 }
 0x34a   :  { %v230_v49 = vsel %vm229_vm9, %v227_v48, -inf }
 0x34b   :  { %231 = vmax.xlane.f32.xlu0 %v230_v49 }
 0x3be   :  { %v232_v50 = vpop.xlane.xlu0 %231 }
 0x3bf   :  { %v233_v51 = vsub.f32 %v227_v48, %v232_v50 }
 0x3c1   :  { %v234_v52 = vmul.f32 1.442695, %v233_v51 }
 0x3c3   :  { %321 = vpow2.f32 %v234_v52 }
 0x3c9   :  { %v322_v53 = vpop.eup %321 }
 0x3ca   :  { %v236_v54 = vsel %vm229_vm9, %v322_v53, 0.0 }
 0x3cb   :  { %237 = vadd.xlane.f32.xlu1 %v236_v54 }
 0x43e   :  { %v238_v55 = vpop.xlane.xlu1 %237 }
 0x43f   :  { %323 = vlog2.f32 %v238_v55 }
 0x445   :  { %v324_v56 = vpop.eup %323 }
 0x446   :  { %v240_v57 = vmul.f32 0.6931472, %v324_v56 }
 0x448   :  { %v241_v58 = vsub.f32 %v233_v51, %v240_v57 }
 0x44a   :  { %242 = vst [vmem:[#allocation11] sm:$0x3] %v241_v58 }
 0x44b   :  { %253 = dma.vmem_to_hbm [thread:$0]  %s249_s9, 32, %s251_s2, [#allocation7]  }
 0x44c   :  { %487 = dma.done.wait [#allocation7], 32  }
 0x44d   :  { %488 = vsyncadd [#allocation7], 4294967264 }
 0x44e   :  { %489 = dma.done.wait [#allocation13], 64  }
 0x44f   :  { %490 = vsyncadd [#allocation13], 4294967232 }
 0x450   :  { %288 = vsyncpa [#allocation6], 1 }
 0x451   :  { %289 = vsyncpa [#allocation9], 1 }
 0x452   :  { %290 = vsyncpa [#allocation7], 1 }
 0x453   :  { %291 = vsyncpa [#allocation13], 1 }

</bundles_post_ra>
